<compile_context>
chip_gen: v7x
topology: tpu7x:2x2x1
jax: 0.10.0
libtpu: 0.0.40
codegen_flags: <defaults>
</compile_context>

<pallas_src>
import functools
import inspect
import warnings

import jax
import jax.numpy as jnp
from jax import lax
from jax.experimental import pallas as pl
from jax.experimental.pallas import tpu as pltpu

_NEG_INF = float(jnp.finfo(jnp.float32).min)


def _lin_relu(a, w_ref, b_ref):
    """1x1 conv (+ folded eval-mode BN) + ReLU: bf16 MXU matmul, f32 accum/bias."""
    y = lax.dot_general(a, w_ref[...],
                        dimension_numbers=(((1,), (0,)), ((), ())),
                        preferred_element_type=jnp.float32)
    return jnp.maximum(y + b_ref[...], 0.0)


# ---------------------------------------------------------------------------
# Kernel 1: key/value projections over the (tiny, padded) proxy tokens.
# Runs once per batch element; hoisted out of the per-query-tile attention
# kernel so f_object / f_down are not recomputed HW//TQ times.
# ---------------------------------------------------------------------------
def _kv_kernel(p_ref, wo1_ref, bo1_ref, wo2_ref, bo2_ref, wd_ref, bd_ref,
               key_ref, value_ref):
    cdt = p_ref.dtype
    p = p_ref[0]                                               # [HWp_pad, C]
    k1 = _lin_relu(p, wo1_ref, bo1_ref).astype(cdt)
    key_ref[0] = _lin_relu(k1, wo2_ref, bo2_ref).astype(key_ref.dtype)
    value_ref[0] = _lin_relu(p, wd_ref, bd_ref).astype(value_ref.dtype)


# ---------------------------------------------------------------------------
# Kernel 2: one (batch, query-tile) slab of the attention block.
# ---------------------------------------------------------------------------
def _attn_kernel(x_ref, k_ref, v_ref,
                 wp1_ref, bp1_ref, wp2_ref, bp2_ref,   # f_pixel (2 stages)
                 wu_ref, bu_ref,                       # f_up
                 out_ref, *, inv_sqrt_key, hwp_real):
    cdt = x_ref.dtype
    x = x_ref[0]                                               # [TQ,      C]
    key = k_ref[0]                                             # [HWp_pad, K]
    value = v_ref[0]                                           # [HWp_pad, K]

    q1 = _lin_relu(x, wp1_ref, bp1_ref).astype(cdt)
    query = _lin_relu(q1, wp2_ref, bp2_ref).astype(cdt)        # [TQ, K]

    # scaled dot-product attention over proxy tokens; contraction on the shared
    # K axis so no key transpose is materialized.
    sim = lax.dot_general(query, key,
                          dimension_numbers=(((1,), (1,)), ((), ())),
                          preferred_element_type=jnp.float32) * inv_sqrt_key
    if hwp_real < sim.shape[-1]:                               # mask padded proxy columns
        col = lax.broadcasted_iota(jnp.int32, sim.shape, 1)
        sim = jnp.where(col < hwp_real, sim, _NEG_INF)
    sim = jnp.exp(sim - jnp.max(sim, axis=-1, keepdims=True))
    # EUP approx reciprocal: ~1e-3 relative error on the softmax denominator.
    sim = sim * pl.reciprocal(jnp.sum(sim, axis=-1, keepdims=True), approx=True)

    context = lax.dot_general(sim.astype(cdt), value,
                              dimension_numbers=(((1,), (0,)), ((), ())),
                              preferred_element_type=jnp.float32)   # [TQ, K]
    context = _lin_relu(context.astype(cdt), wu_ref, bu_ref)        # [TQ, C]
    out_ref[0] = context.astype(out_ref.dtype)


# ---------------------------------------------------------------------------
# Parameter construction (deterministic) + eval-mode BN folding
# ---------------------------------------------------------------------------
def _conv_bn_params(key, c_in, c_out, eps=1e-5):
    """1x1 conv (with bias) + eval-mode BatchNorm folded: y = x @ W + b."""
    kw, kb, kg, kbeta, km, kv = jax.random.split(key, 6)
    w = jax.random.normal(kw, (c_out, c_in), jnp.float32) * 0.1
    b = jax.random.normal(kb, (c_out,), jnp.float32) * 0.05
    gamma = 1.0 + 0.1 * jax.random.normal(kg, (c_out,), jnp.float32)
    beta = 0.1 * jax.random.normal(kbeta, (c_out,), jnp.float32)
    mean = 0.1 * jax.random.normal(km, (c_out,), jnp.float32)
    var = jnp.abs(jax.random.normal(kv, (c_out,), jnp.float32)) * 0.5 + 0.5
    scale = gamma / jnp.sqrt(var + eps)
    w_eff = (w * scale[:, None]).T                 # [c_in, c_out]
    b_eff = (b - mean) * scale + beta              # [c_out]
    return w_eff, b_eff


def make_params(key, in_channels, key_channels):
    keys = jax.random.split(key, 6)
    wp1, bp1 = _conv_bn_params(keys[0], in_channels, key_channels)   # f_pixel[0]
    wp2, bp2 = _conv_bn_params(keys[1], key_channels, key_channels)  # f_pixel[1]
    wo1, bo1 = _conv_bn_params(keys[2], in_channels, key_channels)   # f_object[0]
    wo2, bo2 = _conv_bn_params(keys[3], key_channels, key_channels)  # f_object[1]
    wd, bd = _conv_bn_params(keys[4], in_channels, key_channels)     # f_down
    wu, bu = _conv_bn_params(keys[5], key_channels, in_channels)     # f_up
    params = dict(wp1=wp1, bp1=bp1, wp2=wp2, bp2=bp2,
                  wo1=wo1, bo1=bo1, wo2=wo2, bo2=bo2,
                  wd=wd, bd=bd, wu=wu, bu=bu)
    # biases as [1, C] rows so they broadcast in VMEM
    for name in list(params):
        if name.startswith("b"):
            params[name] = params[name].reshape(1, -1)
    return params


_KV_PARAM_NAMES = ("wo1", "bo1", "wo2", "bo2", "wd", "bd")
_PROJ_PARAM_NAMES = ("wp1", "bp1", "wp2", "bp2", "wu", "bu")


# ---------------------------------------------------------------------------
# Capability / budget helpers
# ---------------------------------------------------------------------------
def _supports_buffered_blockspec():
    """Explicit feature check: can BlockSpec take pipeline_mode=pl.Buffered(k)?"""
    if not hasattr(pl, "Buffered"):
        return False
    try:
        return "pipeline_mode" in inspect.signature(pl.BlockSpec).parameters
    except (TypeError, ValueError):
        return False


def _vmem_capacity_bytes(default=64 * 1024 * 1024):
    """Per-TensorCore VMEM capacity; conservative (v7x-sized) fallback."""
    get_info = getattr(pltpu, "get_tpu_info", None)
    if get_info is None:
        return default
    try:
        info = get_info()
    except Exception:                       # capability probe only
        return default
    return int(getattr(info, "vmem_capacity_bytes", default))


def _vmem_budget():
    """(query-tile cap, vmem_limit_bytes) derived per TPU generation."""
    cap = _vmem_capacity_bytes()
    if cap <= 64 * 1024 * 1024:             # v7x-class: 64 MiB per TC
        return 1024, 48 * 1024 * 1024
    return 2048, 64 * 1024 * 1024           # v5e / v6e-class: 128 MiB


def _choose_tq(hw, n_batch, cap):
    """Largest divisor of hw that is a multiple of 16 (bf16 sublane tiling),
    preferring an even tile count at batch=1 (balanced megacore split)."""
    cap = min(cap, hw)

    def divisors(step):
        return [t for t in range(step, cap + 1, step) if hw % t == 0]

    cands = divisors(16) or divisors(8)
    if cands:
        if n_batch == 1:
            even = [t for t in cands if (hw // t) % 2 == 0]
            if even:
                return even[-1]
        return cands[-1]
    if hw <= 4096:
        return hw                            # single full tile still fits
    raise ValueError(
        f"HW={hw} has no query-tile divisor <= {cap}; pad HW or pass tq=...")


# ---------------------------------------------------------------------------
# pallas_call plumbing
# ---------------------------------------------------------------------------
def _kv_call(p, kv_args, *, key_channels, compute_dtype, vmem_limit,
             single_buffer_weights):
    n, hwp_pad, c = p.shape
    kc = key_channels
    extra = {"pipeline_mode": pl.Buffered(1)} if single_buffer_weights else {}

    def const_spec(arr):
        nd = arr.ndim
        return pl.BlockSpec(arr.shape, lambda b, _nd=nd: (0,) * _nd, **extra)

    in_specs = ([pl.BlockSpec((1, hwp_pad, c), lambda b: (b, 0, 0))]
                + [const_spec(a) for a in kv_args])
    out_specs = (pl.BlockSpec((1, hwp_pad, kc), lambda b: (b, 0, 0)),
                 pl.BlockSpec((1, hwp_pad, kc), lambda b: (b, 0, 0)))

    return pl.pallas_call(
        _kv_kernel,
        out_shape=(jax.ShapeDtypeStruct((n, hwp_pad, kc), compute_dtype),
                   jax.ShapeDtypeStruct((n, hwp_pad, kc), compute_dtype)),
        grid_spec=pltpu.PrefetchScalarGridSpec(
            num_scalar_prefetch=0, grid=(n,),
            in_specs=in_specs, out_specs=out_specs),
        compiler_params=pltpu.CompilerParams(
            dimension_semantics=("parallel",),
            vmem_limit_bytes=vmem_limit),
    )(p, *kv_args)


def _attention_call(x, key, value, proj_args, *, key_channels, hwp_real, tq,
                    out_dtype, vmem_limit, single_buffer_weights):
    n, hw, c = x.shape
    _, hwp_pad, kc = key.shape
    n_qt = hw // tq

    # Constant-index weight/bias blocks: never re-fetched across the grid, so
    # single buffering halves their VMEM residency.
    extra = {"pipeline_mode": pl.Buffered(1)} if single_buffer_weights else {}

    def const_spec(arr):
        nd = arr.ndim
        return pl.BlockSpec(arr.shape, lambda b, q, _nd=nd: (0,) * _nd, **extra)

    in_specs = ([pl.BlockSpec((1, tq, c), lambda b, q: (b, q, 0)),          # x tile
                 pl.BlockSpec((1, hwp_pad, kc), lambda b, q: (b, 0, 0)),    # key
                 pl.BlockSpec((1, hwp_pad, kc), lambda b, q: (b, 0, 0))]    # value
                + [const_spec(a) for a in proj_args])
    out_spec = pl.BlockSpec((1, tq, c), lambda b, q: (b, q, 0))

    kernel = functools.partial(_attn_kernel,
                               inv_sqrt_key=float(key_channels) ** -0.5,
                               hwp_real=hwp_real)

    flops_per_tile = 2 * (tq * (c * kc + kc * kc)     # f_pixel on the tile
                          + 2 * tq * hwp_pad * kc     # sim + context matmuls
                          + tq * kc * c)              # f_up
    cost = pl.CostEstimate(
        flops=int(n * n_qt * flops_per_tile),
        transcendentals=int(n * hw * hwp_pad),
        bytes_accessed=int(x.size * x.dtype.itemsize
                           + key.size * key.dtype.itemsize
                           + value.size * value.dtype.itemsize
                           + sum(int(a.size) * a.dtype.itemsize for a in proj_args)
                           + n * hw * c * jnp.dtype(out_dtype).itemsize))

    return pl.pallas_call(
        kernel,
        out_shape=jax.ShapeDtypeStruct((n, hw, c), out_dtype),
        grid_spec=pltpu.PrefetchScalarGridSpec(
            num_scalar_prefetch=0,
            grid=(n, n_qt),
            in_specs=in_specs,
            out_specs=out_spec),
        compiler_params=pltpu.CompilerParams(
            dimension_semantics=("parallel", "parallel"),
            vmem_limit_bytes=vmem_limit),
        cost_estimate=cost,
    )(x, key, value, *proj_args)


def object_attention_block_tokens(x_tokens, p_tokens, params, key_channels, *,
                                  tq=None, compute_dtype=jnp.bfloat16,
                                  out_dtype=jnp.bfloat16):
    """Channels-last entry point: x [N, HW, C], proxy [N, HWp, C] -> [N, HW, C]."""
    n, hw, c = x_tokens.shape
    _, hwp, _ = p_tokens.shape

    tq_cap, vmem_limit = _vmem_budget()
    if tq is None:
        tq = _choose_tq(hw, n, tq_cap)
    assert hw % tq == 0, (hw, tq)

    # Pad proxy tokens to a lane-dense count (multiple of 128); padded columns
    # are masked out of the softmax inside the kernel.
    hwp_pad = max(128, ((hwp + 127) // 128) * 128)
    x = x_tokens.astype(compute_dtype)
    p = p_tokens.astype(compute_dtype)
    if hwp_pad != hwp:
        p = jnp.pad(p, ((0, 0), (0, hwp_pad - hwp), (0, 0)))

    def prep(name):
        a = params[name]
        # weights in bf16 for the MXU; biases stay f32 on the accumulation path
        return a.astype(compute_dtype) if name.startswith("w") else a.astype(jnp.float32)

    kv_args = [prep(name) for name in _KV_PARAM_NAMES]
    proj_args = [prep(name) for name in _PROJ_PARAM_NAMES]

    def _run(single_buffer):
        key, value = _kv_call(p, kv_args, key_channels=key_channels,
                              compute_dtype=compute_dtype, vmem_limit=vmem_limit,
                              single_buffer_weights=single_buffer)
        return _attention_call(x, key, value, proj_args,
                               key_channels=key_channels, hwp_real=hwp, tq=tq,
                               out_dtype=out_dtype, vmem_limit=vmem_limit,
                               single_buffer_weights=single_buffer)

    if _supports_buffered_blockspec():
        try:
            return _run(True)
        except Exception as e:  # noqa: BLE001 - warned, then retried without Buffered(1)
            warnings.warn(
                "single-buffered weight BlockSpecs (pl.Buffered(1)) were rejected "
                f"({e!r}); retrying with default double buffering (2x weight VMEM).")
            return _run(False)
    return _run(False)


def object_attention_block(feats_nchw, proxy_nchw, params, key_channels, *,
                           tq=None, compute_dtype=jnp.bfloat16,
                           out_dtype=jnp.bfloat16):
    """NCHW wrapper mirroring the PyTorch module interface.

    Callers that already hold channels-last activations should call
    object_attention_block_tokens() directly to avoid the two full HBM
    transpose round-trips below.
    """
    n, c, h, w = feats_nchw.shape
    _, _, hp, wp = proxy_nchw.shape
    x = jnp.transpose(feats_nchw, (0, 2, 3, 1)).reshape(n, h * w, c)
    p = jnp.transpose(proxy_nchw, (0, 2, 3, 1)).reshape(n, hp * wp, c)
    out_tokens = object_attention_block_tokens(
        x, p, params, key_channels, tq=tq,
        compute_dtype=compute_dtype, out_dtype=out_dtype)
    return jnp.transpose(out_tokens.reshape(n, h, w, c), (0, 3, 1, 2))


# ---------------------------------------------------------------------------
# Pure-JAX reference (eval-mode PyTorch forward, same bf16 matmul precision)
# ---------------------------------------------------------------------------
def _reference(feats_nchw, proxy_nchw, params, key_channels,
               compute_dtype=jnp.bfloat16):
    n, c, h, w = feats_nchw.shape
    _, _, hp, wp = proxy_nchw.shape
    x = jnp.transpose(feats_nchw, (0, 2, 3, 1)).reshape(n, h * w, c)
    p = jnp.transpose(proxy_nchw, (0, 2, 3, 1)).reshape(n, hp * wp, c)
    P = params
    cast = lambda a: a.astype(compute_dtype)

    def lr(a, wname, bname):
        y = jnp.einsum("ntc,ck->ntk", cast(a), cast(P[wname]),
                       preferred_element_type=jnp.float32) + P[bname]
        return jnp.maximum(y, 0.0)

    q = cast(lr(cast(lr(x, "wp1", "bp1")), "wp2", "bp2"))
    k = cast(lr(cast(lr(p, "wo1", "bo1")), "wo2", "bo2"))
    v = cast(lr(p, "wd", "bd"))
    sim = jnp.einsum("nqk,npk->nqp", q, k,
                     preferred_element_type=jnp.float32) * (float(key_channels) ** -0.5)
    sim = jax.nn.softmax(sim, axis=-1)
    ctx = jnp.einsum("nqp,npk->nqk", cast(sim), v,
                     preferred_element_type=jnp.float32)
    ctx = lr(cast(ctx), "wu", "bu")
    return jnp.transpose(ctx.reshape(n, h, w, c), (0, 3, 1, 2)).astype(jnp.float32)


if __name__ == "__main__":
    in_channels, key_channels = 32, 16
    N, H, W = 2, 16, 16          # feats spatial
    Hp, Wp = 8, 1                # proxy: one representation per object class

    root = jax.random.PRNGKey(0)
    k_feat, k_proxy, k_params = jax.random.split(root, 3)
    feats = jax.random.normal(k_feat, (N, in_channels, H, W), jnp.float32)
    proxy = jax.random.normal(k_proxy, (N, in_channels, Hp, Wp), jnp.float32)
    params = make_params(k_params, in_channels, key_channels)

    # tq=128 -> 2 query tiles per batch element, exercising the (N, HW//TQ) grid;
    # proxy (HWp=8) is padded to 128 tokens and masked in-kernel.
    out = object_attention_block(feats, proxy, params, key_channels, tq=128)
    out = jax.block_until_ready(out)

    ref = jax.block_until_ready(_reference(feats, proxy, params, key_channels))

    assert out.shape == (N, in_channels, H, W), out.shape
    out_f32 = out.astype(jnp.float32)
    ref_q = ref.astype(jnp.bfloat16).astype(jnp.float32)   # kernel emits bf16
    max_err = float(jnp.max(jnp.abs(out_f32 - ref_q)))
    assert jnp.allclose(out_f32, ref_q, rtol=2.5e-2, atol=2.5e-2), max_err

    print("KERNEL_OK")
</pallas_src>

<mosaic_0001>
module attributes {stable_mosaic.version = 11 : i64} {
  func.func @_kv_kernel(%arg0: i32, %arg1: memref<1x128x32xbf16, #tpu.memory_space<vmem>>, %arg2: memref<32x16xbf16, #tpu.memory_space<vmem>>, %arg3: memref<1x16xf32, #tpu.memory_space<vmem>>, %arg4: memref<16x16xbf16, #tpu.memory_space<vmem>>, %arg5: memref<1x16xf32, #tpu.memory_space<vmem>>, %arg6: memref<32x16xbf16, #tpu.memory_space<vmem>>, %arg7: memref<1x16xf32, #tpu.memory_space<vmem>>, %arg8: memref<1x128x16xbf16, #tpu.memory_space<vmem>>, %arg9: memref<1x128x16xbf16, #tpu.memory_space<vmem>>) attributes {dimension_semantics = [#tpu.dimension_semantics<parallel>], iteration_bounds = array<i64: 2>, scalar_prefetch = 0 : i64, scratch_operands = 0 : i64, tpu.core_type = #tpu.core_type<tc>, window_params = [{transform_indices = @transform_0, window_bounds = array<i64: 1, 128, 32>}, {pipeline_mode = #tpu.pipeline_mode<synchronous>, transform_indices = @transform_1, window_bounds = array<i64: 32, 16>}, {pipeline_mode = #tpu.pipeline_mode<synchronous>, transform_indices = @transform_2, window_bounds = array<i64: 1, 16>}, {pipeline_mode = #tpu.pipeline_mode<synchronous>, transform_indices = @transform_3, window_bounds = array<i64: 16, 16>}, {pipeline_mode = #tpu.pipeline_mode<synchronous>, transform_indices = @transform_4, window_bounds = array<i64: 1, 16>}, {pipeline_mode = #tpu.pipeline_mode<synchronous>, transform_indices = @transform_5, window_bounds = array<i64: 32, 16>}, {pipeline_mode = #tpu.pipeline_mode<synchronous>, transform_indices = @transform_6, window_bounds = array<i64: 1, 16>}, {transform_indices = @transform_7, window_bounds = array<i64: 1, 128, 16>}, {transform_indices = @transform_8, window_bounds = array<i64: 1, 128, 16>}]} {
    %c0 = arith.constant 0 : index
    %c0_0 = arith.constant 0 : index
    %c0_1 = arith.constant 0 : index
    %0 = vector.load %arg1[%c0, %c0_0, %c0_1] : memref<1x128x32xbf16, #tpu.memory_space<vmem>>, vector<1x128x32xbf16>
    %1 = vector.shape_cast %0 : vector<1x128x32xbf16> to vector<128x32xbf16>
    %c0_2 = arith.constant 0 : index
    %c0_3 = arith.constant 0 : index
    %2 = vector.load %arg2[%c0_2, %c0_3] : memref<32x16xbf16, #tpu.memory_space<vmem>>, vector<32x16xbf16>
    %cst = arith.constant dense<0.000000e+00> : vector<128x16xf32>
    %3 = tpu.matmul %1, %2, %cst {dimension_numbers = #tpu.dot_dimension_numbers<[1], [0], [0], [1], [0, 0, 1, 1], [], []>} : vector<128x32xbf16>, vector<32x16xbf16>, vector<128x16xf32> -> vector<128x16xf32>
    %c0_4 = arith.constant 0 : index
    %c0_5 = arith.constant 0 : index
    %4 = vector.load %arg3[%c0_4, %c0_5] : memref<1x16xf32, #tpu.memory_space<vmem>>, vector<1x16xf32>
    %5 = vector.broadcast %4 : vector<1x16xf32> to vector<128x16xf32>
    %6 = arith.addf %3, %5 : vector<128x16xf32>
    %cst_6 = arith.constant 0.000000e+00 : f32
    %7 = vector.broadcast %cst_6 : f32 to vector<128x16xf32>
    %8 = arith.maximumf %6, %7 : vector<128x16xf32>
    %9 = arith.truncf %8 : vector<128x16xf32> to vector<128x16xbf16>
    %c0_7 = arith.constant 0 : index
    %c0_8 = arith.constant 0 : index
    %10 = vector.load %arg4[%c0_7, %c0_8] : memref<16x16xbf16, #tpu.memory_space<vmem>>, vector<16x16xbf16>
    %cst_9 = arith.constant dense<0.000000e+00> : vector<128x16xf32>
    %11 = tpu.matmul %9, %10, %cst_9 {dimension_numbers = #tpu.dot_dimension_numbers<[1], [0], [0], [1], [0, 0, 1, 1], [], []>} : vector<128x16xbf16>, vector<16x16xbf16>, vector<128x16xf32> -> vector<128x16xf32>
    %c0_10 = arith.constant 0 : index
    %c0_11 = arith.constant 0 : index
    %12 = vector.load %arg5[%c0_10, %c0_11] : memref<1x16xf32, #tpu.memory_space<vmem>>, vector<1x16xf32>
    %13 = vector.broadcast %12 : vector<1x16xf32> to vector<128x16xf32>
    %14 = arith.addf %11, %13 : vector<128x16xf32>
    %cst_12 = arith.constant 0.000000e+00 : f32
    %15 = vector.broadcast %cst_12 : f32 to vector<128x16xf32>
    %16 = arith.maximumf %14, %15 : vector<128x16xf32>
    %17 = arith.truncf %16 : vector<128x16xf32> to vector<128x16xbf16>
    %c0_13 = arith.constant 0 : index
    %c0_14 = arith.constant 0 : index
    %c0_15 = arith.constant 0 : index
    %18 = vector.load %arg8[%c0_13, %c0_14, %c0_15] : memref<1x128x16xbf16, #tpu.memory_space<vmem>>, vector<1x128x16xbf16>
    %19 = vector.shape_cast %18 : vector<1x128x16xbf16> to vector<128x16xbf16>
    %20 = vector.shape_cast %17 : vector<128x16xbf16> to vector<1x128x16xbf16>
    tpu.vector_store %arg8[%c0_13, %c0_14, %c0_15], %20 {strides = array<i32>} : memref<1x128x16xbf16, #tpu.memory_space<vmem>>, vector<1x128x16xbf16>,
    %c0_16 = arith.constant 0 : index
    %c0_17 = arith.constant 0 : index
    %21 = vector.load %arg6[%c0_16, %c0_17] : memref<32x16xbf16, #tpu.memory_space<vmem>>, vector<32x16xbf16>
    %cst_18 = arith.constant dense<0.000000e+00> : vector<128x16xf32>
    %22 = tpu.matmul %1, %21, %cst_18 {dimension_numbers = #tpu.dot_dimension_numbers<[1], [0], [0], [1], [0, 0, 1, 1], [], []>} : vector<128x32xbf16>, vector<32x16xbf16>, vector<128x16xf32> -> vector<128x16xf32>
    %c0_19 = arith.constant 0 : index
    %c0_20 = arith.constant 0 : index
    %23 = vector.load %arg7[%c0_19, %c0_20] : memref<1x16xf32, #tpu.memory_space<vmem>>, vector<1x16xf32>
    %24 = vector.broadcast %23 : vector<1x16xf32> to vector<128x16xf32>
    %25 = arith.addf %22, %24 : vector<128x16xf32>
    %cst_21 = arith.constant 0.000000e+00 : f32
    %26 = vector.broadcast %cst_21 : f32 to vector<128x16xf32>
    %27 = arith.maximumf %25, %26 : vector<128x16xf32>
    %28 = arith.truncf %27 : vector<128x16xf32> to vector<128x16xbf16>
    %c0_22 = arith.constant 0 : index
    %c0_23 = arith.constant 0 : index
    %c0_24 = arith.constant 0 : index
    %29 = vector.load %arg9[%c0_22, %c0_23, %c0_24] : memref<1x128x16xbf16, #tpu.memory_space<vmem>>, vector<1x128x16xbf16>
    %30 = vector.shape_cast %29 : vector<1x128x16xbf16> to vector<128x16xbf16>
    %31 = vector.shape_cast %28 : vector<128x16xbf16> to vector<1x128x16xbf16>
    tpu.vector_store %arg9[%c0_22, %c0_23, %c0_24], %31 {strides = array<i32>} : memref<1x128x16xbf16, #tpu.memory_space<vmem>>, vector<1x128x16xbf16>,
    return
  }
  func.func @transform_0(%arg0: i32) -> (i32, i32, i32) {
    %c0_i32 = arith.constant 0 : i32
    %c0_i32_0 = arith.constant 0 : i32
    %c0_i32_1 = arith.constant 0 : i32
    return %arg0, %c0_i32, %c0_i32_0 : i32, i32, i32
  }
  func.func @transform_1(%arg0: i32) -> (i32, i32) {
    %c0_i32 = arith.constant 0 : i32
    %c0_i32_0 = arith.constant 0 : i32
    %c0_i32_1 = arith.constant 0 : i32
    return %c0_i32, %c0_i32_0 : i32, i32
  }
  func.func @transform_2(%arg0: i32) -> (i32, i32) {
    %c0_i32 = arith.constant 0 : i32
    %c0_i32_0 = arith.constant 0 : i32
    %c0_i32_1 = arith.constant 0 : i32
    return %c0_i32, %c0_i32_0 : i32, i32
  }
  func.func @transform_3(%arg0: i32) -> (i32, i32) {
    %c0_i32 = arith.constant 0 : i32
    %c0_i32_0 = arith.constant 0 : i32
    %c0_i32_1 = arith.constant 0 : i32
    return %c0_i32, %c0_i32_0 : i32, i32
  }
  func.func @transform_4(%arg0: i32) -> (i32, i32) {
    %c0_i32 = arith.constant 0 : i32
    %c0_i32_0 = arith.constant 0 : i32
    %c0_i32_1 = arith.constant 0 : i32
    return %c0_i32, %c0_i32_0 : i32, i32
  }
  func.func @transform_5(%arg0: i32) -> (i32, i32) {
    %c0_i32 = arith.constant 0 : i32
    %c0_i32_0 = arith.constant 0 : i32
    %c0_i32_1 = arith.constant 0 : i32
    return %c0_i32, %c0_i32_0 : i32, i32
  }
  func.func @transform_6(%arg0: i32) -> (i32, i32) {
    %c0_i32 = arith.constant 0 : i32
    %c0_i32_0 = arith.constant 0 : i32
    %c0_i32_1 = arith.constant 0 : i32
    return %c0_i32, %c0_i32_0 : i32, i32
  }
  func.func @transform_7(%arg0: i32) -> (i32, i32, i32) {
    %c0_i32 = arith.constant 0 : i32
    %c0_i32_0 = arith.constant 0 : i32
    %c0_i32_1 = arith.constant 0 : i32
    return %arg0, %c0_i32, %c0_i32_0 : i32, i32, i32
  }
  func.func @transform_8(%arg0: i32) -> (i32, i32, i32) {
    %c0_i32 = arith.constant 0 : i32
    %c0_i32_0 = arith.constant 0 : i32
    %c0_i32_1 = arith.constant 0 : i32
    return %arg0, %c0_i32, %c0_i32_0 : i32, i32, i32
  }
}

module attributes {stable_mosaic.version = 11 : i64} {
  func.func @_kv_kernel(%arg0: i32, %arg1: memref<1x128x32xbf16, #tpu.memory_space<vmem>>, %arg2: memref<32x16xbf16, #tpu.memory_space<vmem>>, %arg3: memref<1x16xf32, #tpu.memory_space<vmem>>, %arg4: memref<16x16xbf16, #tpu.memory_space<vmem>>, %arg5: memref<1x16xf32, #tpu.memory_space<vmem>>, %arg6: memref<32x16xbf16, #tpu.memory_space<vmem>>, %arg7: memref<1x16xf32, #tpu.memory_space<vmem>>, %arg8: memref<1x128x16xbf16, #tpu.memory_space<vmem>>, %arg9: memref<1x128x16xbf16, #tpu.memory_space<vmem>>) attributes {dimension_semantics = [#tpu.dimension_semantics<parallel>], iteration_bounds = array<i64: 2>, scalar_prefetch = 0 : i64, scratch_operands = 0 : i64, tpu.core_type = #tpu.core_type<tc>, window_params = [{transform_indices = @transform_0, window_bounds = array<i64: 1, 128, 32>}, {pipeline_mode = #tpu.pipeline_mode<synchronous>, transform_indices = @transform_1, window_bounds = array<i64: 32, 16>}, {pipeline_mode = #tpu.pipeline_mode<synchronous>, transform_indices = @transform_2, window_bounds = array<i64: 1, 16>}, {pipeline_mode = #tpu.pipeline_mode<synchronous>, transform_indices = @transform_3, window_bounds = array<i64: 16, 16>}, {pipeline_mode = #tpu.pipeline_mode<synchronous>, transform_indices = @transform_4, window_bounds = array<i64: 1, 16>}, {pipeline_mode = #tpu.pipeline_mode<synchronous>, transform_indices = @transform_5, window_bounds = array<i64: 32, 16>}, {pipeline_mode = #tpu.pipeline_mode<synchronous>, transform_indices = @transform_6, window_bounds = array<i64: 1, 16>}, {transform_indices = @transform_7, window_bounds = array<i64: 1, 128, 16>}, {transform_indices = @transform_8, window_bounds = array<i64: 1, 128, 16>}]} {
    %c0 = arith.constant 0 : index
    %c0_0 = arith.constant 0 : index
    %c0_1 = arith.constant 0 : index
    %0 = vector.load %arg1[%c0, %c0_0, %c0_1] : memref<1x128x32xbf16, #tpu.memory_space<vmem>>, vector<1x128x32xbf16>
    %1 = vector.shape_cast %0 : vector<1x128x32xbf16> to vector<128x32xbf16>
    %c0_2 = arith.constant 0 : index
    %c0_3 = arith.constant 0 : index
    %2 = vector.load %arg2[%c0_2, %c0_3] : memref<32x16xbf16, #tpu.memory_space<vmem>>, vector<32x16xbf16>
    %cst = arith.constant dense<0.000000e+00> : vector<128x16xf32>
    %3 = tpu.matmul %1, %2, %cst {dimension_numbers = #tpu.dot_dimension_numbers<[1], [0], [0], [1], [0, 0, 1, 1], [], []>} : vector<128x32xbf16>, vector<32x16xbf16>, vector<128x16xf32> -> vector<128x16xf32>
    %c0_4 = arith.constant 0 : index
    %c0_5 = arith.constant 0 : index
    %4 = vector.load %arg3[%c0_4, %c0_5] : memref<1x16xf32, #tpu.memory_space<vmem>>, vector<1x16xf32>
    %5 = vector.broadcast %4 : vector<1x16xf32> to vector<128x16xf32>
    %6 = arith.addf %3, %5 : vector<128x16xf32>
    %cst_6 = arith.constant 0.000000e+00 : f32
    %7 = vector.broadcast %cst_6 : f32 to vector<128x16xf32>
    %8 = arith.maximumf %6, %7 : vector<128x16xf32>
    %9 = arith.truncf %8 : vector<128x16xf32> to vector<128x16xbf16>
    %c0_7 = arith.constant 0 : index
    %c0_8 = arith.constant 0 : index
    %10 = vector.load %arg4[%c0_7, %c0_8] : memref<16x16xbf16, #tpu.memory_space<vmem>>, vector<16x16xbf16>
    %cst_9 = arith.constant dense<0.000000e+00> : vector<128x16xf32>
    %11 = tpu.matmul %9, %10, %cst_9 {dimension_numbers = #tpu.dot_dimension_numbers<[1], [0], [0], [1], [0, 0, 1, 1], [], []>} : vector<128x16xbf16>, vector<16x16xbf16>, vector<128x16xf32> -> vector<128x16xf32>
    %c0_10 = arith.constant 0 : index
    %c0_11 = arith.constant 0 : index
    %12 = vector.load %arg5[%c0_10, %c0_11] : memref<1x16xf32, #tpu.memory_space<vmem>>, vector<1x16xf32>
    %13 = vector.broadcast %12 : vector<1x16xf32> to vector<128x16xf32>
    %14 = arith.addf %11, %13 : vector<128x16xf32>
    %cst_12 = arith.constant 0.000000e+00 : f32
    %15 = vector.broadcast %cst_12 : f32 to vector<128x16xf32>
    %16 = arith.maximumf %14, %15 : vector<128x16xf32>
    %17 = arith.truncf %16 : vector<128x16xf32> to vector<128x16xbf16>
    %c0_13 = arith.constant 0 : index
    %c0_14 = arith.constant 0 : index
    %c0_15 = arith.constant 0 : index
    %18 = vector.load %arg8[%c0_13, %c0_14, %c0_15] : memref<1x128x16xbf16, #tpu.memory_space<vmem>>, vector<1x128x16xbf16>
    %19 = vector.shape_cast %18 : vector<1x128x16xbf16> to vector<128x16xbf16>
    %20 = vector.shape_cast %17 : vector<128x16xbf16> to vector<1x128x16xbf16>
    tpu.vector_store %arg8[%c0_13, %c0_14, %c0_15], %20 {strides = array<i32>} : memref<1x128x16xbf16, #tpu.memory_space<vmem>>, vector<1x128x16xbf16>,
    %c0_16 = arith.constant 0 : index
    %c0_17 = arith.constant 0 : index
    %21 = vector.load %arg6[%c0_16, %c0_17] : memref<32x16xbf16, #tpu.memory_space<vmem>>, vector<32x16xbf16>
    %cst_18 = arith.constant dense<0.000000e+00> : vector<128x16xf32>
    %22 = tpu.matmul %1, %21, %cst_18 {dimension_numbers = #tpu.dot_dimension_numbers<[1], [0], [0], [1], [0, 0, 1, 1], [], []>} : vector<128x32xbf16>, vector<32x16xbf16>, vector<128x16xf32> -> vector<128x16xf32>
    %c0_19 = arith.constant 0 : index
    %c0_20 = arith.constant 0 : index
    %23 = vector.load %arg7[%c0_19, %c0_20] : memref<1x16xf32, #tpu.memory_space<vmem>>, vector<1x16xf32>
    %24 = vector.broadcast %23 : vector<1x16xf32> to vector<128x16xf32>
    %25 = arith.addf %22, %24 : vector<128x16xf32>
    %cst_21 = arith.constant 0.000000e+00 : f32
    %26 = vector.broadcast %cst_21 : f32 to vector<128x16xf32>
    %27 = arith.maximumf %25, %26 : vector<128x16xf32>
    %28 = arith.truncf %27 : vector<128x16xf32> to vector<128x16xbf16>
    %c0_22 = arith.constant 0 : index
    %c0_23 = arith.constant 0 : index
    %c0_24 = arith.constant 0 : index
    %29 = vector.load %arg9[%c0_22, %c0_23, %c0_24] : memref<1x128x16xbf16, #tpu.memory_space<vmem>>, vector<1x128x16xbf16>
    %30 = vector.shape_cast %29 : vector<1x128x16xbf16> to vector<128x16xbf16>
    %31 = vector.shape_cast %28 : vector<128x16xbf16> to vector<1x128x16xbf16>
    tpu.vector_store %arg9[%c0_22, %c0_23, %c0_24], %31 {strides = array<i32>} : memref<1x128x16xbf16, #tpu.memory_space<vmem>>, vector<1x128x16xbf16>,
    return
  }
  func.func @transform_0(%arg0: i32) -> (i32, i32, i32) {
    %c0_i32 = arith.constant 0 : i32
    %c0_i32_0 = arith.constant 0 : i32
    %c0_i32_1 = arith.constant 0 : i32
    return %arg0, %c0_i32, %c0_i32_0 : i32, i32, i32
  }
  func.func @transform_1(%arg0: i32) -> (i32, i32) {
    %c0_i32 = arith.constant 0 : i32
    %c0_i32_0 = arith.constant 0 : i32
    %c0_i32_1 = arith.constant 0 : i32
    return %c0_i32, %c0_i32_0 : i32, i32
  }
  func.func @transform_2(%arg0: i32) -> (i32, i32) {
    %c0_i32 = arith.constant 0 : i32
    %c0_i32_0 = arith.constant 0 : i32
    %c0_i32_1 = arith.constant 0 : i32
    return %c0_i32, %c0_i32_0 : i32, i32
  }
  func.func @transform_3(%arg0: i32) -> (i32, i32) {
    %c0_i32 = arith.constant 0 : i32
    %c0_i32_0 = arith.constant 0 : i32
    %c0_i32_1 = arith.constant 0 : i32
    return %c0_i32, %c0_i32_0 : i32, i32
  }
  func.func @transform_4(%arg0: i32) -> (i32, i32) {
    %c0_i32 = arith.constant 0 : i32
    %c0_i32_0 = arith.constant 0 : i32
    %c0_i32_1 = arith.constant 0 : i32
    return %c0_i32, %c0_i32_0 : i32, i32
  }
  func.func @transform_5(%arg0: i32) -> (i32, i32) {
    %c0_i32 = arith.constant 0 : i32
    %c0_i32_0 = arith.constant 0 : i32
    %c0_i32_1 = arith.constant 0 : i32
    return %c0_i32, %c0_i32_0 : i32, i32
  }
  func.func @transform_6(%arg0: i32) -> (i32, i32) {
    %c0_i32 = arith.constant 0 : i32
    %c0_i32_0 = arith.constant 0 : i32
    %c0_i32_1 = arith.constant 0 : i32
    return %c0_i32, %c0_i32_0 : i32, i32
  }
  func.func @transform_7(%arg0: i32) -> (i32, i32, i32) {
    %c0_i32 = arith.constant 0 : i32
    %c0_i32_0 = arith.constant 0 : i32
    %c0_i32_1 = arith.constant 0 : i32
    return %arg0, %c0_i32, %c0_i32_0 : i32, i32, i32
  }
  func.func @transform_8(%arg0: i32) -> (i32, i32, i32) {
    %c0_i32 = arith.constant 0 : i32
    %c0_i32_0 = arith.constant 0 : i32
    %c0_i32_1 = arith.constant 0 : i32
    return %arg0, %c0_i32, %c0_i32_0 : i32, i32, i32
  }
}

</mosaic_0001>

<bundles_post_ra>
// kernel: tpu_custom_call.1
= control target key start
LH: loop header
LB: loop body
LE: loop exit
PB: predicated region body
PF: predicated region fallthrough
CT: control target
= control target key end

     0   :  { %s1366_s27 = smov 0   ;;  %s1575_s0 = inlined_call_operand.vmem [shape: bf16[2,128,32], index: 0, kind: input, shape index: {}]   ;;  %s1576_s1 = inlined_call_operand.vmem [shape: bf16[32,16], index: 1, kind: input, shape index: {}]   ;;  %s1577_s2 = inlined_call_operand.vmem [shape: f32[1,16], index: 2, kind: input, shape index: {}]   ;;  %s1578_s3 = inlined_call_operand.vmem [shape: bf16[16,16], index: 3, kind: input, shape index: {}]   ;;  %s1579_s4 = inlined_call_operand.vmem [shape: f32[1,16], index: 4, kind: input, shape index: {}]   ;;  %s1580_s5 = inlined_call_operand.vmem [shape: bf16[32,16], index: 5, kind: input, shape index: {}]   ;;  %s1581_s6 = inlined_call_operand.vmem [shape: f32[1,16], index: 6, kind: input, shape index: {}]   ;;  %s1582_s7 = inlined_call_operand.vmem [shape: bf16[2,128,16], index: 7, kind: output, shape index: {0}]   ;;  %s1583_s8 = inlined_call_operand.vmem [shape: bf16[2,128,16], index: 8, kind: output, shape index: {1}]  }
   0x1 LB: > { %s1083_s28 = sadd.s32 4294967295, %s1319_s27   ;;  %p1087_p0 = scmp.ge.s32.totalorder %s1319_s27, 1  ;;  %s1319_s27 = sphi %s1366_s27, %s19_s27  }
   0x2   : > { %p265_p1 = scmp.lt.s32.totalorder %s1319_s27, 3 }
   0x4   : > { %p266_p2 = pnand %p1087_p0, %p265_p1 }
   0x5   : > { %v1300_v0 = vld [vmem:[%s1576_s1] sm:$0xff] (!%p266_p2)   ;;  %p304_p3 = scmp.lt.s32.totalorder (!%p266_p2), %s1083_s28, 1  ;;  %v1301_v1 = vld [vmem:[%s1576_s1 + $0x8] sm:$0xff] (!%p266_p2)   ;;  %vm399_vm0 = vcmask (!%p266_p2), 261120   ;;  %vm560_vm1 = vcmask (!%p266_p2), 130048   ;;  %vm762_vm2 = vcmask (!%p266_p2), 125952  }
   0x6   : > { %269 = sbr.rel (%p266_p2) target bundleno = 518 (0x206), region = 48  ;;  %1232 = vmatprep.subr.bf16.mxu0 (!%p266_p2), %v1300_v0  ;;  %v1310_v10 = vld [vmem:[%s1578_s3] sm:$0xff] (!%p266_p2)   ;;  %v1312_v44 = vld [vmem:[%s1580_s5 + $0x8] sm:$0xff] (!%p266_p2)  }
   0x7   : > { %1233 = vmatpush3.bf16.msra.mxu0 (!%p266_p2), %v1300_v0  ;;  %1290 = vmatprep.subr.bf16.mxu1 (!%p266_p2), %v1310_v10  ;;  %v1311_v11 = vld [vmem:[%s1580_s5] sm:$0xff] (!%p266_p2)  }
   0x8   : > { %1234 = vmatprep.subr.bf16.mxu0 (!%p266_p2), %v1301_v1  ;;  %1291 = vmatpush3.bf16.msra.mxu1 (!%p266_p2), %v1310_v10  ;;  %v1094_v12 = vld [vmem:[%s1577_s2] ss:$0 sm:$0xff] (!%p266_p2) }
   0x9   : > { %1270 = vmatprep.subr.bf16.mxu1 (!%p266_p2), %v1311_v11 }
   0xb   : > { %1235 = vmatpush3.bf16.msra.mxu0 (!%p266_p2), %v1301_v1 }
   0xc   : > { %1252 = vmatprep.subr.bf16.mxu0 (!%p266_p2), %v1310_v10 }
   0xd   : > { %s1585_s28 = smov (!%p304_p3, %s1083_s28), 1 }
   0xe   : > { %s1380_s11 = sshll.u32 %s1585_s28, 6 }
   0xf   : > { %s308_s14 = scalar_lea.vmem %s1575_s0, %s1380_s11  ;;  %s1466_s28 = scalar_lea.vmem %s1582_s7, %s1380_s11 }
  0x10   : > { %v1386_v2 = vld [vmem:[%s308_s14] sm:$0xff]   ;;  %v1388_v3 = vld [vmem:[%s308_s14 + $0x8] sm:$0xff]   ;;  %v1392_v4 = vld [vmem:[%s308_s14 + $0x10] sm:$0xff]   ;;  %s1525_s12 = scalar_lea.vmem %s1583_s8, %s1380_s11 }
  0x11   : > { %1236 = vmatprep.mubr.msk.bf16.mxu0 %vm399_vm0, %v1386_v2  ;;  %v1398_v5 = vld [vmem:[%s308_s14 + $0x18] sm:$0xff]   ;;  %v1400_v6 = vld [vmem:[%s308_s14 + $0x20] sm:$0xff]   ;;  %v1406_v7 = vld [vmem:[%s308_s14 + $0x28] sm:$0xff]  }
  0x12   : > { %1237 = vmatmul.mubr.msk.bf16.vlgmr.msra.gmra.mrb[0].mxu0 %vm399_vm0, %v1388_v3  ;;  %v1408_v8 = vld [vmem:[%s308_s14 + $0x30] sm:$0xff]   ;;  %v1414_v9 = vld [vmem:[%s308_s14 + $0x38] sm:$0xff]  }
  0x13   : > { %1240 = vmatprep.mubr.msk.bf16.mxu0 %vm399_vm0, %v1392_v4  ;;  %1253 = vmatpush3.bf16.msra.mxu0 %v1310_v10 }
  0x1a   : > { %1241 = vmatmul.mubr.msk.bf16.gmra.mrb[4].mxu0 %vm399_vm0, %v1398_v5 }
  0x1b   : > { %1244 = vmatprep.mubr.msk.bf16.mxu0 %vm399_vm0, %v1400_v6 }
  0x22   : > { %1245 = vmatmul.mubr.msk.bf16.gmra.mrb[8].mxu0 %vm399_vm0, %v1406_v7 }
  0x23   : > { %1248 = vmatprep.mubr.msk.bf16.mxu0 %vm399_vm0, %v1408_v8 }
  0x2a   : > { %1249 = vmatmul.mubr.msk.bf16.gmra.mrb[12].mxu0 %vm399_vm0, %v1414_v9 }
  0xe5   : > { %v1238_v13 = vpop.f32.mrb[0].mxu0 }
  0xe6   : > { %v467_v14 = vadd.f32 %v1238_v13, %v1094_v12  ;;  %v458_v15 = vpop.f32.mrb[1].mxu0 }
  0xe7   : > { %v459_v16 = vadd.f32 %v1094_v12, %v458_v15  ;;  %v1239_v17 = vpop.f32.mrb[2].mxu0 }
  0xe8   : > { %v470_v18 = vadd.f32 %v1239_v17, %v1094_v12  ;;  %v461_v19 = vpop.f32.mrb[3].mxu0  ;;  %v523_v21 = vmax.f32 %v467_v14, 0.0 }
  0xe9   : > { %v462_v20 = vadd.f32 %v1094_v12, %v461_v19  ;;  %v521_v23 = vmax.f32 %v459_v16, 0.0 }
  0xea   : > { %v524_v22 = vmax.f32 %v470_v18, 0.0 }
  0xeb   : > { %v522_v24 = vmax.f32 %v462_v20, 0.0 }
  0xec   : > { %v538_v25 = vpack.c.bf16 %v524_v22, %v523_v21 }
  0xed   : > { %v537_v26 = vpack.c.bf16 %v522_v24, %v521_v23  ;;  %v1242_v27 = vpop.f32.mrb[4].mxu0 }
  0xee   : > { %v483_v28 = vadd.f32 %v1242_v27, %v1094_v12  ;;  %v474_v29 = vpop.f32.mrb[5].mxu0 }
  0xef   : > { %v475_v30 = vadd.f32 %v1094_v12, %v474_v29  ;;  %v1243_v31 = vpop.f32.mrb[6].mxu0  ;;  %1254 = vmatprep.mubr.msk.bf16.mxu0 %vm560_vm1, %v537_v26 }
  0xf0   : > { %v486_v32 = vadd.f32 %v1243_v31, %v1094_v12  ;;  %v477_v33 = vpop.f32.mrb[7].mxu0  ;;  %1255 = vmatmul.mubr.msk.bf16.vlgmr.msra.gmra.mrb[16].mxu0 %vm560_vm1, %v538_v25  ;;  %v527_v35 = vmax.f32 %v483_v28, 0.0 }
  0xf1   : > { %v478_v34 = vadd.f32 %v1094_v12, %v477_v33  ;;  %v525_v37 = vmax.f32 %v475_v30, 0.0 }
  0xf2   : > { %v528_v36 = vmax.f32 %v486_v32, 0.0 }
  0xf3   : > { %v526_v38 = vmax.f32 %v478_v34, 0.0 }
  0xf4   : > { %v540_v39 = vpack.c.bf16 %v528_v36, %v527_v35 }
  0xf5   : > { %v1246_v40 = vpop.f32.mrb[8].mxu0  ;;  %v539_v41 = vpack.c.bf16 %v526_v38, %v525_v37 }
  0xf6   : > { %v499_v42 = vadd.f32 %v1246_v40, %v1094_v12  ;;  %v490_v43 = vpop.f32.mrb[9].mxu0 }
  0xf7   : > { %v491_v45 = vadd.f32 %v1094_v12, %v490_v43  ;;  %v1247_v46 = vpop.f32.mrb[10].mxu0  ;;  %1258 = vmatprep.mubr.msk.bf16.mxu1 %vm560_vm1, %v539_v41 }
  0xf8   : > { %v502_v47 = vadd.f32 %v1247_v46, %v1094_v12  ;;  %v493_v48 = vpop.f32.mrb[11].mxu0  ;;  %1259 = vmatmul.mubr.msk.bf16.vlgmr.msra.gmra.mrb[0].mxu1 %vm560_vm1, %v540_v39  ;;  %v531_v50 = vmax.f32 %v499_v42, 0.0 }
  0xf9   : > { %v494_v49 = vadd.f32 %v1094_v12, %v493_v48  ;;  %1271 = vmatpush3.bf16.msra.mxu1 %v1311_v11  ;;  %v529_v52 = vmax.f32 %v491_v45, 0.0 }
  0xfa   : > { %v532_v51 = vmax.f32 %v502_v47, 0.0  ;;  %1272 = vmatprep.subr.bf16.mxu1 %v1312_v44 }
  0xfb   : > { %v530_v53 = vmax.f32 %v494_v49, 0.0 }
  0xfc   : > { %v542_v54 = vpack.c.bf16 %v532_v51, %v531_v50 }
  0xfd   : > { %v541_v55 = vpack.c.bf16 %v530_v53, %v529_v52  ;;  %v1250_v56 = vpop.f32.mrb[12].mxu0  ;;  %1273 = vmatpush3.bf16.msra.mxu1 %v1312_v44 }
  0xfe   : > { %v515_v57 = vadd.f32 %v1250_v56, %v1094_v12  ;;  %v506_v58 = vpop.f32.mrb[13].mxu0 }
  0xff   : > { %v507_v59 = vadd.f32 %v1094_v12, %v506_v58  ;;  %v1251_v60 = vpop.f32.mrb[14].mxu0  ;;  %1262 = vmatprep.mubr.msk.bf16.mxu1 %vm560_vm1, %v541_v55 }
 0x100   : > { %v518_v61 = vadd.f32 %v1251_v60, %v1094_v12  ;;  %v509_v62 = vpop.f32.mrb[15].mxu0  ;;  %1263 = vmatmul.mubr.msk.bf16.gmra.mrb[4].mxu1 %vm560_vm1, %v542_v54  ;;  %v535_v0 = vmax.f32 %v515_v57, 0.0 }
 0x101   : > { %v510_v63 = vadd.f32 %v1094_v12, %v509_v62  ;;  %v533_v10 = vmax.f32 %v507_v59, 0.0 }
 0x102   : > { %v536_v1 = vmax.f32 %v518_v61, 0.0 }
 0x103   : > { %v534_v11 = vmax.f32 %v510_v63, 0.0 }
 0x104   : > { %v544_v13 = vpack.c.bf16 %v536_v1, %v535_v0 }
 0x105   : > { %v543_v14 = vpack.c.bf16 %v534_v11, %v533_v10 }
 0x107   : > { %1266 = vmatprep.mubr.msk.bf16.mxu1 %vm560_vm1, %v543_v14  ;;  %v1508_v14 = vld [vmem:[%s1581_s6] ss:$0 sm:$0xff] }
 0x108   : > { %1267 = vmatmul.mubr.msk.bf16.gmra.mrb[8].mxu1 %vm560_vm1, %v544_v13 }
 0x109   : > { %1274 = vmatprep.mubr.msk.bf16.mxu1 %vm399_vm0, %v1386_v2  ;;  %v1457_v2 = vld [vmem:[%s1579_s4] ss:$0 sm:$0xff] }
 0x110   : > { %1275 = vmatmul.mubr.msk.bf16.vlgmr.msra.gmra.mrb[12].mxu1 %vm399_vm0, %v1388_v3 }
 0x111   : > { %1278 = vmatprep.mubr.msk.bf16.mxu1 %vm399_vm0, %v1392_v4 }
 0x118   : > { %1279 = vmatmul.mubr.msk.bf16.gmra.mrb[16].mxu1 %vm399_vm0, %v1398_v5 }
 0x119   : > { %1282 = vmatprep.mubr.msk.bf16.mxu1 %vm399_vm0, %v1400_v6 }
 0x120   : > { %1283 = vmatmul.mubr.msk.bf16.gmra.mrb[20].mxu1 %vm399_vm0, %v1406_v7 }
 0x121   : > { %1286 = vmatprep.mubr.msk.bf16.mxu1 %vm399_vm0, %v1408_v8 }
 0x128   : > { %1287 = vmatmul.mubr.msk.bf16.gmra.mrb[24].mxu1 %vm399_vm0, %v1414_v9 }
 0x1c3   : > { %v1256_v3 = vpop.f32.mrb[16].mxu0 }
 0x1c4   : > { %v628_v4 = vadd.f32 %v1256_v3, %v1457_v2  ;;  %v619_v5 = vpop.f32.mrb[17].mxu0 }
 0x1c5   : > { %v620_v6 = vadd.f32 %v1457_v2, %v619_v5  ;;  %v1257_v12 = vpop.f32.mrb[18].mxu0 }
 0x1c6   : > { %v684_v15 = vmax.f32 %v628_v4, 0.0  ;;  %v631_v7 = vadd.f32 %v1257_v12, %v1457_v2  ;;  %v622_v16 = vpop.f32.mrb[19].mxu0 }
 0x1c7   : > { %v682_v8 = vmax.f32 %v620_v6, 0.0  ;;  %v623_v9 = vadd.f32 %v1457_v2, %v622_v16 }
 0x1c8   : > { %v1173_v17 = vpack.c.bf16 %v684_v15, %v684_v15  ;;  %v685_v18 = vmax.f32 %v631_v7, 0.0 }
 0x1c9   : > { %v1171_v19 = vpack.c.bf16 %v682_v8, %v682_v8  ;;  %v683_v20 = vmax.f32 %v623_v9, 0.0 }
 0x1ca   : > { %765 = vst.msk [vmem:[%s1466_s28 + $0x8] sm:$0xf] %vm762_vm2, %v1173_v17  ;;  %v1174_v21 = vpack.c.bf16 %v685_v18, %v685_v18 }
 0x1cb   : > { %763 = vst.msk [vmem:[%s1466_s28] sm:$0xf] %vm762_vm2, %v1171_v19  ;;  %v1172_v22 = vpack.c.bf16 %v683_v20, %v683_v20  ;;  %v1260_v23 = vpop.f32.mrb[0].mxu1 }
 0x1cc   : > { %766 = vst.msk [vmem:[%s1466_s28 + $0xc] sm:$0xf] %vm762_vm2, %v1174_v21  ;;  %v644_v24 = vadd.f32 %v1260_v23, %v1457_v2  ;;  %v635_v25 = vpop.f32.mrb[1].mxu1 }
 0x1cd   : > { %764 = vst.msk [vmem:[%s1466_s28 + $0x4] sm:$0xf] %vm762_vm2, %v1172_v22  ;;  %v636_v26 = vadd.f32 %v1457_v2, %v635_v25  ;;  %v1261_v27 = vpop.f32.mrb[2].mxu1 }
 0x1ce   : > { %v688_v28 = vmax.f32 %v644_v24, 0.0  ;;  %v647_v29 = vadd.f32 %v1261_v27, %v1457_v2  ;;  %v638_v30 = vpop.f32.mrb[3].mxu1 }
 0x1cf   : > { %v686_v31 = vmax.f32 %v636_v26, 0.0  ;;  %v639_v32 = vadd.f32 %v1457_v2, %v638_v30 }
 0x1d0   : > { %v1177_v33 = vpack.c.bf16 %v688_v28, %v688_v28  ;;  %v689_v34 = vmax.f32 %v647_v29, 0.0 }
 0x1d1   : > { %v1175_v35 = vpack.c.bf16 %v686_v31, %v686_v31  ;;  %v687_v36 = vmax.f32 %v639_v32, 0.0 }
 0x1d2   : > { %769 = vst.msk [vmem:[%s1466_s28 + $0x18] sm:$0xf] %vm762_vm2, %v1177_v33  ;;  %v1178_v37 = vpack.c.bf16 %v689_v34, %v689_v34 }
 0x1d3   : > { %767 = vst.msk [vmem:[%s1466_s28 + $0x10] sm:$0xf] %vm762_vm2, %v1175_v35  ;;  %v1176_v38 = vpack.c.bf16 %v687_v36, %v687_v36  ;;  %v1264_v39 = vpop.f32.mrb[4].mxu1 }
 0x1d4   : > { %770 = vst.msk [vmem:[%s1466_s28 + $0x1c] sm:$0xf] %vm762_vm2, %v1178_v37  ;;  %v660_v40 = vadd.f32 %v1264_v39, %v1457_v2  ;;  %v651_v41 = vpop.f32.mrb[5].mxu1 }
 0x1d5   : > { %768 = vst.msk [vmem:[%s1466_s28 + $0x14] sm:$0xf] %vm762_vm2, %v1176_v38  ;;  %v652_v42 = vadd.f32 %v1457_v2, %v651_v41  ;;  %v1265_v43 = vpop.f32.mrb[6].mxu1 }
 0x1d6   : > { %v692_v44 = vmax.f32 %v660_v40, 0.0  ;;  %v663_v45 = vadd.f32 %v1265_v43, %v1457_v2  ;;  %v654_v46 = vpop.f32.mrb[7].mxu1 }
 0x1d7   : > { %v690_v47 = vmax.f32 %v652_v42, 0.0  ;;  %v655_v48 = vadd.f32 %v1457_v2, %v654_v46 }
 0x1d8   : > { %v1181_v49 = vpack.c.bf16 %v692_v44, %v692_v44  ;;  %v693_v50 = vmax.f32 %v663_v45, 0.0 }
 0x1d9   : > { %v1179_v51 = vpack.c.bf16 %v690_v47, %v690_v47  ;;  %v691_v52 = vmax.f32 %v655_v48, 0.0 }
 0x1da   : > { %773 = vst.msk [vmem:[%s1466_s28 + $0x28] sm:$0xf] %vm762_vm2, %v1181_v49  ;;  %v1182_v53 = vpack.c.bf16 %v693_v50, %v693_v50 }
 0x1db   : > { %771 = vst.msk [vmem:[%s1466_s28 + $0x20] sm:$0xf] %vm762_vm2, %v1179_v51  ;;  %v1180_v54 = vpack.c.bf16 %v691_v52, %v691_v52  ;;  %v1268_v55 = vpop.f32.mrb[8].mxu1 }
 0x1dc   : > { %774 = vst.msk [vmem:[%s1466_s28 + $0x2c] sm:$0xf] %vm762_vm2, %v1182_v53  ;;  %v676_v56 = vadd.f32 %v1268_v55, %v1457_v2  ;;  %v667_v57 = vpop.f32.mrb[9].mxu1 }
 0x1dd   : > { %772 = vst.msk [vmem:[%s1466_s28 + $0x24] sm:$0xf] %vm762_vm2, %v1180_v54  ;;  %v668_v58 = vadd.f32 %v1457_v2, %v667_v57  ;;  %v1269_v59 = vpop.f32.mrb[10].mxu1 }
 0x1de   : > { %v696_v60 = vmax.f32 %v676_v56, 0.0  ;;  %v679_v61 = vadd.f32 %v1269_v59, %v1457_v2  ;;  %v670_v62 = vpop.f32.mrb[11].mxu1 }
 0x1df   : > { %v694_v63 = vmax.f32 %v668_v58, 0.0  ;;  %v671_v0 = vadd.f32 %v1457_v2, %v670_v62 }
 0x1e0   : > { %v1185_v1 = vpack.c.bf16 %v696_v60, %v696_v60  ;;  %v697_v10 = vmax.f32 %v679_v61, 0.0 }
 0x1e1   : > { %v1183_v11 = vpack.c.bf16 %v694_v63, %v694_v63  ;;  %v695_v13 = vmax.f32 %v671_v0, 0.0 }
 0x1e2   : > { %777 = vst.msk [vmem:[%s1466_s28 + $0x38] sm:$0xf] %vm762_vm2, %v1185_v1  ;;  %v1186_v3 = vpack.c.bf16 %v697_v10, %v697_v10 }
 0x1e3   : > { %775 = vst.msk [vmem:[%s1466_s28 + $0x30] sm:$0xf] %vm762_vm2, %v1183_v11  ;;  %v1184_v4 = vpack.c.bf16 %v695_v13, %v695_v13  ;;  %v1276_v5 = vpop.f32.mrb[12].mxu1 }
 0x1e4   : > { %778 = vst.msk [vmem:[%s1466_s28 + $0x3c] sm:$0xf] %vm762_vm2, %v1186_v3  ;;  %v845_v2 = vadd.f32 %v1276_v5, %v1508_v14  ;;  %v836_v6 = vpop.f32.mrb[13].mxu1 }
 0x1e5   : > { %776 = vst.msk [vmem:[%s1466_s28 + $0x34] sm:$0xf] %vm762_vm2, %v1184_v4  ;;  %v837_v12 = vadd.f32 %v1508_v14, %v836_v6  ;;  %v1277_v15 = vpop.f32.mrb[14].mxu1 }
 0x1e6   : > { %v901_v7 = vmax.f32 %v845_v2, 0.0  ;;  %v848_v16 = vadd.f32 %v1277_v15, %v1508_v14  ;;  %v839_v8 = vpop.f32.mrb[15].mxu1 }
 0x1e7   : > { %v899_v9 = vmax.f32 %v837_v12, 0.0  ;;  %v840_v17 = vadd.f32 %v1508_v14, %v839_v8 }
 0x1e8   : > { %v1189_v18 = vpack.c.bf16 %v901_v7, %v901_v7  ;;  %v902_v19 = vmax.f32 %v848_v16, 0.0 }
 0x1e9   : > { %v1187_v20 = vpack.c.bf16 %v899_v9, %v899_v9  ;;  %v900_v21 = vmax.f32 %v840_v17, 0.0 }
 0x1ea   : > { %981 = vst.msk [vmem:[%s1525_s12 + $0x8] sm:$0xf] %vm762_vm2, %v1189_v18  ;;  %v1190_v22 = vpack.c.bf16 %v902_v19, %v902_v19 }
 0x1eb   : > { %979 = vst.msk [vmem:[%s1525_s12] sm:$0xf] %vm762_vm2, %v1187_v20  ;;  %v1188_v23 = vpack.c.bf16 %v900_v21, %v900_v21  ;;  %v1280_v24 = vpop.f32.mrb[16].mxu1 }
 0x1ec   : > { %982 = vst.msk [vmem:[%s1525_s12 + $0xc] sm:$0xf] %vm762_vm2, %v1190_v22  ;;  %v861_v25 = vadd.f32 %v1280_v24, %v1508_v14  ;;  %v852_v26 = vpop.f32.mrb[17].mxu1 }
 0x1ed   : > { %980 = vst.msk [vmem:[%s1525_s12 + $0x4] sm:$0xf] %vm762_vm2, %v1188_v23  ;;  %v853_v27 = vadd.f32 %v1508_v14, %v852_v26  ;;  %v1281_v28 = vpop.f32.mrb[18].mxu1 }
 0x1ee   : > { %v905_v29 = vmax.f32 %v861_v25, 0.0  ;;  %v864_v30 = vadd.f32 %v1281_v28, %v1508_v14  ;;  %v855_v31 = vpop.f32.mrb[19].mxu1 }
 0x1ef   : > { %v903_v32 = vmax.f32 %v853_v27, 0.0  ;;  %v856_v33 = vadd.f32 %v1508_v14, %v855_v31 }
 0x1f0   : > { %v1193_v34 = vpack.c.bf16 %v905_v29, %v905_v29  ;;  %v906_v35 = vmax.f32 %v864_v30, 0.0 }
 0x1f1   : > { %v1191_v36 = vpack.c.bf16 %v903_v32, %v903_v32  ;;  %v904_v37 = vmax.f32 %v856_v33, 0.0 }
 0x1f2   : > { %985 = vst.msk [vmem:[%s1525_s12 + $0x18] sm:$0xf] %vm762_vm2, %v1193_v34  ;;  %v1194_v38 = vpack.c.bf16 %v906_v35, %v906_v35 }
 0x1f3   : > { %983 = vst.msk [vmem:[%s1525_s12 + $0x10] sm:$0xf] %vm762_vm2, %v1191_v36  ;;  %v1192_v39 = vpack.c.bf16 %v904_v37, %v904_v37  ;;  %v1284_v40 = vpop.f32.mrb[20].mxu1 }
 0x1f4   : > { %986 = vst.msk [vmem:[%s1525_s12 + $0x1c] sm:$0xf] %vm762_vm2, %v1194_v38  ;;  %v877_v41 = vadd.f32 %v1284_v40, %v1508_v14  ;;  %v868_v42 = vpop.f32.mrb[21].mxu1 }
 0x1f5   : > { %984 = vst.msk [vmem:[%s1525_s12 + $0x14] sm:$0xf] %vm762_vm2, %v1192_v39  ;;  %v869_v43 = vadd.f32 %v1508_v14, %v868_v42  ;;  %v1285_v44 = vpop.f32.mrb[22].mxu1 }
 0x1f6   : > { %v909_v45 = vmax.f32 %v877_v41, 0.0  ;;  %v880_v46 = vadd.f32 %v1285_v44, %v1508_v14  ;;  %v871_v47 = vpop.f32.mrb[23].mxu1 }
 0x1f7   : > { %v907_v48 = vmax.f32 %v869_v43, 0.0  ;;  %v872_v49 = vadd.f32 %v1508_v14, %v871_v47 }
 0x1f8   : > { %v1197_v50 = vpack.c.bf16 %v909_v45, %v909_v45  ;;  %v910_v51 = vmax.f32 %v880_v46, 0.0 }
 0x1f9   : > { %v1195_v52 = vpack.c.bf16 %v907_v48, %v907_v48  ;;  %v908_v53 = vmax.f32 %v872_v49, 0.0 }
 0x1fa   : > { %989 = vst.msk [vmem:[%s1525_s12 + $0x28] sm:$0xf] %vm762_vm2, %v1197_v50  ;;  %v1198_v54 = vpack.c.bf16 %v910_v51, %v910_v51 }
 0x1fb   : > { %987 = vst.msk [vmem:[%s1525_s12 + $0x20] sm:$0xf] %vm762_vm2, %v1195_v52  ;;  %v1196_v55 = vpack.c.bf16 %v908_v53, %v908_v53  ;;  %v1288_v56 = vpop.f32.mrb[24].mxu1 }
 0x1fc   : > { %990 = vst.msk [vmem:[%s1525_s12 + $0x2c] sm:$0xf] %vm762_vm2, %v1198_v54  ;;  %v893_v57 = vadd.f32 %v1288_v56, %v1508_v14  ;;  %v884_v58 = vpop.f32.mrb[25].mxu1 }
 0x1fd   : > { %988 = vst.msk [vmem:[%s1525_s12 + $0x24] sm:$0xf] %vm762_vm2, %v1196_v55  ;;  %v885_v59 = vadd.f32 %v1508_v14, %v884_v58  ;;  %v1289_v60 = vpop.f32.mrb[26].mxu1 }
 0x1fe   : > { %v913_v61 = vmax.f32 %v893_v57, 0.0  ;;  %v896_v62 = vadd.f32 %v1289_v60, %v1508_v14  ;;  %v887_v63 = vpop.f32.mrb[27].mxu1 }
 0x1ff   : > { %v911_v0 = vmax.f32 %v885_v59, 0.0  ;;  %v888_v1 = vadd.f32 %v1508_v14, %v887_v63 }
 0x200   : > { %v1201_v10 = vpack.c.bf16 %v913_v61, %v913_v61  ;;  %v914_v11 = vmax.f32 %v896_v62, 0.0 }
 0x201   : > { %v1199_v13 = vpack.c.bf16 %v911_v0, %v911_v0  ;;  %v912_v3 = vmax.f32 %v888_v1, 0.0 }
 0x202   : > { %993 = vst.msk [vmem:[%s1525_s12 + $0x38] sm:$0xf] %vm762_vm2, %v1201_v10  ;;  %v1202_v4 = vpack.c.bf16 %v914_v11, %v914_v11 }
 0x203   : > { %991 = vst.msk [vmem:[%s1525_s12 + $0x30] sm:$0xf] %vm762_vm2, %v1199_v13  ;;  %v1200_v5 = vpack.c.bf16 %v912_v3, %v912_v3 }
 0x204   : > { %994 = vst.msk [vmem:[%s1525_s12 + $0x3c] sm:$0xf] %vm762_vm2, %v1202_v4 }
 0x205   : > { %992 = vst.msk [vmem:[%s1525_s12 + $0x34] sm:$0xf] %vm762_vm2, %v1200_v5 }
 0x206 PF: > { %s19_s27 = sadd.s32 1, %s1319_s27  }
 0x207   : > { %p16_p4 = scmp.ge.s32.totalorder %s19_s27, 4  }
 0x209   :  { %18 = sbr.rel (!%p16_p4) target bundleno = 1 (0x1), region = 90 }

// kernel: tpu_custom_call.1
= control target key start
LH: loop header
LB: loop body
LE: loop exit
PB: predicated region body
PF: predicated region fallthrough
CT: control target
= control target key end

     0   :  { %s1366_s27 = smov 0   ;;  %s1575_s0 = inlined_call_operand.vmem [shape: bf16[2,128,32], index: 0, kind: input, shape index: {}]   ;;  %s1576_s1 = inlined_call_operand.vmem [shape: bf16[32,16], index: 1, kind: input, shape index: {}]   ;;  %s1577_s2 = inlined_call_operand.vmem [shape: f32[1,16], index: 2, kind: input, shape index: {}]   ;;  %s1578_s3 = inlined_call_operand.vmem [shape: bf16[16,16], index: 3, kind: input, shape index: {}]   ;;  %s1579_s4 = inlined_call_operand.vmem [shape: f32[1,16], index: 4, kind: input, shape index: {}]   ;;  %s1580_s5 = inlined_call_operand.vmem [shape: bf16[32,16], index: 5, kind: input, shape index: {}]   ;;  %s1581_s6 = inlined_call_operand.vmem [shape: f32[1,16], index: 6, kind: input, shape index: {}]   ;;  %s1582_s7 = inlined_call_operand.vmem [shape: bf16[2,128,16], index: 7, kind: output, shape index: {0}]   ;;  %s1583_s8 = inlined_call_operand.vmem [shape: bf16[2,128,16], index: 8, kind: output, shape index: {1}]  }
   0x1 LB: > { %s1083_s28 = sadd.s32 4294967295, %s1319_s27   ;;  %p1087_p0 = scmp.ge.s32.totalorder %s1319_s27, 1  ;;  %s1319_s27 = sphi %s1366_s27, %s19_s27  }
   0x2   : > { %p265_p1 = scmp.lt.s32.totalorder %s1319_s27, 3 }
   0x4   : > { %p266_p2 = pnand %p1087_p0, %p265_p1 }
   0x5   : > { %v1300_v0 = vld [vmem:[%s1576_s1] sm:$0xff] (!%p266_p2)   ;;  %p304_p3 = scmp.lt.s32.totalorder (!%p266_p2), %s1083_s28, 1  ;;  %v1301_v1 = vld [vmem:[%s1576_s1 + $0x8] sm:$0xff] (!%p266_p2)   ;;  %vm399_vm0 = vcmask (!%p266_p2), 261120   ;;  %vm560_vm1 = vcmask (!%p266_p2), 130048   ;;  %vm762_vm2 = vcmask (!%p266_p2), 125952  }
   0x6   : > { %269 = sbr.rel (%p266_p2) target bundleno = 518 (0x206), region = 48  ;;  %1232 = vmatprep.subr.bf16.mxu0 (!%p266_p2), %v1300_v0  ;;  %v1310_v10 = vld [vmem:[%s1578_s3] sm:$0xff] (!%p266_p2)   ;;  %v1312_v44 = vld [vmem:[%s1580_s5 + $0x8] sm:$0xff] (!%p266_p2)  }
   0x7   : > { %1233 = vmatpush3.bf16.msra.mxu0 (!%p266_p2), %v1300_v0  ;;  %1290 = vmatprep.subr.bf16.mxu1 (!%p266_p2), %v1310_v10  ;;  %v1311_v11 = vld [vmem:[%s1580_s5] sm:$0xff] (!%p266_p2)  }
   0x8   : > { %1234 = vmatprep.subr.bf16.mxu0 (!%p266_p2), %v1301_v1  ;;  %1291 = vmatpush3.bf16.msra.mxu1 (!%p266_p2), %v1310_v10  ;;  %v1094_v12 = vld [vmem:[%s1577_s2] ss:$0 sm:$0xff] (!%p266_p2) }
   0x9   : > { %1270 = vmatprep.subr.bf16.mxu1 (!%p266_p2), %v1311_v11 }
   0xb   : > { %1235 = vmatpush3.bf16.msra.mxu0 (!%p266_p2), %v1301_v1 }
   0xc   : > { %1252 = vmatprep.subr.bf16.mxu0 (!%p266_p2), %v1310_v10 }
   0xd   : > { %s1585_s28 = smov (!%p304_p3, %s1083_s28), 1 }
   0xe   : > { %s1380_s11 = sshll.u32 %s1585_s28, 6 }
   0xf   : > { %s308_s14 = scalar_lea.vmem %s1575_s0, %s1380_s11  ;;  %s1466_s28 = scalar_lea.vmem %s1582_s7, %s1380_s11 }
  0x10   : > { %v1386_v2 = vld [vmem:[%s308_s14] sm:$0xff]   ;;  %v1388_v3 = vld [vmem:[%s308_s14 + $0x8] sm:$0xff]   ;;  %v1392_v4 = vld [vmem:[%s308_s14 + $0x10] sm:$0xff]   ;;  %s1525_s12 = scalar_lea.vmem %s1583_s8, %s1380_s11 }
  0x11   : > { %1236 = vmatprep.mubr.msk.bf16.mxu0 %vm399_vm0, %v1386_v2  ;;  %v1398_v5 = vld [vmem:[%s308_s14 + $0x18] sm:$0xff]   ;;  %v1400_v6 = vld [vmem:[%s308_s14 + $0x20] sm:$0xff]   ;;  %v1406_v7 = vld [vmem:[%s308_s14 + $0x28] sm:$0xff]  }
  0x12   : > { %1237 = vmatmul.mubr.msk.bf16.vlgmr.msra.gmra.mrb[0].mxu0 %vm399_vm0, %v1388_v3  ;;  %v1408_v8 = vld [vmem:[%s308_s14 + $0x30] sm:$0xff]   ;;  %v1414_v9 = vld [vmem:[%s308_s14 + $0x38] sm:$0xff]  }
  0x13   : > { %1240 = vmatprep.mubr.msk.bf16.mxu0 %vm399_vm0, %v1392_v4  ;;  %1253 = vmatpush3.bf16.msra.mxu0 %v1310_v10 }
  0x1a   : > { %1241 = vmatmul.mubr.msk.bf16.gmra.mrb[4].mxu0 %vm399_vm0, %v1398_v5 }
  0x1b   : > { %1244 = vmatprep.mubr.msk.bf16.mxu0 %vm399_vm0, %v1400_v6 }
  0x22   : > { %1245 = vmatmul.mubr.msk.bf16.gmra.mrb[8].mxu0 %vm399_vm0, %v1406_v7 }
  0x23   : > { %1248 = vmatprep.mubr.msk.bf16.mxu0 %vm399_vm0, %v1408_v8 }
  0x2a   : > { %1249 = vmatmul.mubr.msk.bf16.gmra.mrb[12].mxu0 %vm399_vm0, %v1414_v9 }
  0xe5   : > { %v1238_v13 = vpop.f32.mrb[0].mxu0 }
  0xe6   : > { %v467_v14 = vadd.f32 %v1238_v13, %v1094_v12  ;;  %v458_v15 = vpop.f32.mrb[1].mxu0 }
  0xe7   : > { %v459_v16 = vadd.f32 %v1094_v12, %v458_v15  ;;  %v1239_v17 = vpop.f32.mrb[2].mxu0 }
  0xe8   : > { %v470_v18 = vadd.f32 %v1239_v17, %v1094_v12  ;;  %v461_v19 = vpop.f32.mrb[3].mxu0  ;;  %v523_v21 = vmax.f32 %v467_v14, 0.0 }
  0xe9   : > { %v462_v20 = vadd.f32 %v1094_v12, %v461_v19  ;;  %v521_v23 = vmax.f32 %v459_v16, 0.0 }
  0xea   : > { %v524_v22 = vmax.f32 %v470_v18, 0.0 }
  0xeb   : > { %v522_v24 = vmax.f32 %v462_v20, 0.0 }
  0xec   : > { %v538_v25 = vpack.c.bf16 %v524_v22, %v523_v21 }
  0xed   : > { %v537_v26 = vpack.c.bf16 %v522_v24, %v521_v23  ;;  %v1242_v27 = vpop.f32.mrb[4].mxu0 }
  0xee   : > { %v483_v28 = vadd.f32 %v1242_v27, %v1094_v12  ;;  %v474_v29 = vpop.f32.mrb[5].mxu0 }
  0xef   : > { %v475_v30 = vadd.f32 %v1094_v12, %v474_v29  ;;  %v1243_v31 = vpop.f32.mrb[6].mxu0  ;;  %1254 = vmatprep.mubr.msk.bf16.mxu0 %vm560_vm1, %v537_v26 }
  0xf0   : > { %v486_v32 = vadd.f32 %v1243_v31, %v1094_v12  ;;  %v477_v33 = vpop.f32.mrb[7].mxu0  ;;  %1255 = vmatmul.mubr.msk.bf16.vlgmr.msra.gmra.mrb[16].mxu0 %vm560_vm1, %v538_v25  ;;  %v527_v35 = vmax.f32 %v483_v28, 0.0 }
  0xf1   : > { %v478_v34 = vadd.f32 %v1094_v12, %v477_v33  ;;  %v525_v37 = vmax.f32 %v475_v30, 0.0 }
  0xf2   : > { %v528_v36 = vmax.f32 %v486_v32, 0.0 }
  0xf3   : > { %v526_v38 = vmax.f32 %v478_v34, 0.0 }
  0xf4   : > { %v540_v39 = vpack.c.bf16 %v528_v36, %v527_v35 }
  0xf5   : > { %v1246_v40 = vpop.f32.mrb[8].mxu0  ;;  %v539_v41 = vpack.c.bf16 %v526_v38, %v525_v37 }
  0xf6   : > { %v499_v42 = vadd.f32 %v1246_v40, %v1094_v12  ;;  %v490_v43 = vpop.f32.mrb[9].mxu0 }
  0xf7   : > { %v491_v45 = vadd.f32 %v1094_v12, %v490_v43  ;;  %v1247_v46 = vpop.f32.mrb[10].mxu0  ;;  %1258 = vmatprep.mubr.msk.bf16.mxu1 %vm560_vm1, %v539_v41 }
  0xf8   : > { %v502_v47 = vadd.f32 %v1247_v46, %v1094_v12  ;;  %v493_v48 = vpop.f32.mrb[11].mxu0  ;;  %1259 = vmatmul.mubr.msk.bf16.vlgmr.msra.gmra.mrb[0].mxu1 %vm560_vm1, %v540_v39  ;;  %v531_v50 = vmax.f32 %v499_v42, 0.0 }
  0xf9   : > { %v494_v49 = vadd.f32 %v1094_v12, %v493_v48  ;;  %1271 = vmatpush3.bf16.msra.mxu1 %v1311_v11  ;;  %v529_v52 = vmax.f32 %v491_v45, 0.0 }
  0xfa   : > { %v532_v51 = vmax.f32 %v502_v47, 0.0  ;;  %1272 = vmatprep.subr.bf16.mxu1 %v1312_v44 }
  0xfb   : > { %v530_v53 = vmax.f32 %v494_v49, 0.0 }
  0xfc   : > { %v542_v54 = vpack.c.bf16 %v532_v51, %v531_v50 }
  0xfd   : > { %v541_v55 = vpack.c.bf16 %v530_v53, %v529_v52  ;;  %v1250_v56 = vpop.f32.mrb[12].mxu0  ;;  %1273 = vmatpush3.bf16.msra.mxu1 %v1312_v44 }
  0xfe   : > { %v515_v57 = vadd.f32 %v1250_v56, %v1094_v12  ;;  %v506_v58 = vpop.f32.mrb[13].mxu0 }
  0xff   : > { %v507_v59 = vadd.f32 %v1094_v12, %v506_v58  ;;  %v1251_v60 = vpop.f32.mrb[14].mxu0  ;;  %1262 = vmatprep.mubr.msk.bf16.mxu1 %vm560_vm1, %v541_v55 }
 0x100   : > { %v518_v61 = vadd.f32 %v1251_v60, %v1094_v12  ;;  %v509_v62 = vpop.f32.mrb[15].mxu0  ;;  %1263 = vmatmul.mubr.msk.bf16.gmra.mrb[4].mxu1 %vm560_vm1, %v542_v54  ;;  %v535_v0 = vmax.f32 %v515_v57, 0.0 }
 0x101   : > { %v510_v63 = vadd.f32 %v1094_v12, %v509_v62  ;;  %v533_v10 = vmax.f32 %v507_v59, 0.0 }
 0x102   : > { %v536_v1 = vmax.f32 %v518_v61, 0.0 }
 0x103   : > { %v534_v11 = vmax.f32 %v510_v63, 0.0 }
 0x104   : > { %v544_v13 = vpack.c.bf16 %v536_v1, %v535_v0 }
 0x105   : > { %v543_v14 = vpack.c.bf16 %v534_v11, %v533_v10 }
 0x107   : > { %1266 = vmatprep.mubr.msk.bf16.mxu1 %vm560_vm1, %v543_v14  ;;  %v1508_v14 = vld [vmem:[%s1581_s6] ss:$0 sm:$0xff] }
 0x108   : > { %1267 = vmatmul.mubr.msk.bf16.gmra.mrb[8].mxu1 %vm560_vm1, %v544_v13 }
 0x109   : > { %1274 = vmatprep.mubr.msk.bf16.mxu1 %vm399_vm0, %v1386_v2  ;;  %v1457_v2 = vld [vmem:[%s1579_s4] ss:$0 sm:$0xff] }
 0x110   : > { %1275 = vmatmul.mubr.msk.bf16.vlgmr.msra.gmra.mrb[12].mxu1 %vm399_vm0, %v1388_v3 }
 0x111   : > { %1278 = vmatprep.mubr.msk.bf16.mxu1 %vm399_vm0, %v1392_v4 }
 0x118   : > { %1279 = vmatmul.mubr.msk.bf16.gmra.mrb[16].mxu1 %vm399_vm0, %v1398_v5 }
 0x119   : > { %1282 = vmatprep.mubr.msk.bf16.mxu1 %vm399_vm0, %v1400_v6 }
 0x120   : > { %1283 = vmatmul.mubr.msk.bf16.gmra.mrb[20].mxu1 %vm399_vm0, %v1406_v7 }
 0x121   : > { %1286 = vmatprep.mubr.msk.bf16.mxu1 %vm399_vm0, %v1408_v8 }
 0x128   : > { %1287 = vmatmul.mubr.msk.bf16.gmra.mrb[24].mxu1 %vm399_vm0, %v1414_v9 }
 0x1c3   : > { %v1256_v3 = vpop.f32.mrb[16].mxu0 }
 0x1c4   : > { %v628_v4 = vadd.f32 %v1256_v3, %v1457_v2  ;;  %v619_v5 = vpop.f32.mrb[17].mxu0 }
 0x1c5   : > { %v620_v6 = vadd.f32 %v1457_v2, %v619_v5  ;;  %v1257_v12 = vpop.f32.mrb[18].mxu0 }
 0x1c6   : > { %v684_v15 = vmax.f32 %v628_v4, 0.0  ;;  %v631_v7 = vadd.f32 %v1257_v12, %v1457_v2  ;;  %v622_v16 = vpop.f32.mrb[19].mxu0 }
 0x1c7   : > { %v682_v8 = vmax.f32 %v620_v6, 0.0  ;;  %v623_v9 = vadd.f32 %v1457_v2, %v622_v16 }
 0x1c8   : > { %v1173_v17 = vpack.c.bf16 %v684_v15, %v684_v15  ;;  %v685_v18 = vmax.f32 %v631_v7, 0.0 }
 0x1c9   : > { %v1171_v19 = vpack.c.bf16 %v682_v8, %v682_v8  ;;  %v683_v20 = vmax.f32 %v623_v9, 0.0 }
 0x1ca   : > { %765 = vst.msk [vmem:[%s1466_s28 + $0x8] sm:$0xf] %vm762_vm2, %v1173_v17  ;;  %v1174_v21 = vpack.c.bf16 %v685_v18, %v685_v18 }
 0x1cb   : > { %763 = vst.msk [vmem:[%s1466_s28] sm:$0xf] %vm762_vm2, %v1171_v19  ;;  %v1172_v22 = vpack.c.bf16 %v683_v20, %v683_v20  ;;  %v1260_v23 = vpop.f32.mrb[0].mxu1 }
 0x1cc   : > { %766 = vst.msk [vmem:[%s1466_s28 + $0xc] sm:$0xf] %vm762_vm2, %v1174_v21  ;;  %v644_v24 = vadd.f32 %v1260_v23, %v1457_v2  ;;  %v635_v25 = vpop.f32.mrb[1].mxu1 }
 0x1cd   : > { %764 = vst.msk [vmem:[%s1466_s28 + $0x4] sm:$0xf] %vm762_vm2, %v1172_v22  ;;  %v636_v26 = vadd.f32 %v1457_v2, %v635_v25  ;;  %v1261_v27 = vpop.f32.mrb[2].mxu1 }
 0x1ce   : > { %v688_v28 = vmax.f32 %v644_v24, 0.0  ;;  %v647_v29 = vadd.f32 %v1261_v27, %v1457_v2  ;;  %v638_v30 = vpop.f32.mrb[3].mxu1 }
 0x1cf   : > { %v686_v31 = vmax.f32 %v636_v26, 0.0  ;;  %v639_v32 = vadd.f32 %v1457_v2, %v638_v30 }
 0x1d0   : > { %v1177_v33 = vpack.c.bf16 %v688_v28, %v688_v28  ;;  %v689_v34 = vmax.f32 %v647_v29, 0.0 }
 0x1d1   : > { %v1175_v35 = vpack.c.bf16 %v686_v31, %v686_v31  ;;  %v687_v36 = vmax.f32 %v639_v32, 0.0 }
 0x1d2   : > { %769 = vst.msk [vmem:[%s1466_s28 + $0x18] sm:$0xf] %vm762_vm2, %v1177_v33  ;;  %v1178_v37 = vpack.c.bf16 %v689_v34, %v689_v34 }
 0x1d3   : > { %767 = vst.msk [vmem:[%s1466_s28 + $0x10] sm:$0xf] %vm762_vm2, %v1175_v35  ;;  %v1176_v38 = vpack.c.bf16 %v687_v36, %v687_v36  ;;  %v1264_v39 = vpop.f32.mrb[4].mxu1 }
 0x1d4   : > { %770 = vst.msk [vmem:[%s1466_s28 + $0x1c] sm:$0xf] %vm762_vm2, %v1178_v37  ;;  %v660_v40 = vadd.f32 %v1264_v39, %v1457_v2  ;;  %v651_v41 = vpop.f32.mrb[5].mxu1 }
 0x1d5   : > { %768 = vst.msk [vmem:[%s1466_s28 + $0x14] sm:$0xf] %vm762_vm2, %v1176_v38  ;;  %v652_v42 = vadd.f32 %v1457_v2, %v651_v41  ;;  %v1265_v43 = vpop.f32.mrb[6].mxu1 }
 0x1d6   : > { %v692_v44 = vmax.f32 %v660_v40, 0.0  ;;  %v663_v45 = vadd.f32 %v1265_v43, %v1457_v2  ;;  %v654_v46 = vpop.f32.mrb[7].mxu1 }
 0x1d7   : > { %v690_v47 = vmax.f32 %v652_v42, 0.0  ;;  %v655_v48 = vadd.f32 %v1457_v2, %v654_v46 }
 0x1d8   : > { %v1181_v49 = vpack.c.bf16 %v692_v44, %v692_v44  ;;  %v693_v50 = vmax.f32 %v663_v45, 0.0 }
 0x1d9   : > { %v1179_v51 = vpack.c.bf16 %v690_v47, %v690_v47  ;;  %v691_v52 = vmax.f32 %v655_v48, 0.0 }
 0x1da   : > { %773 = vst.msk [vmem:[%s1466_s28 + $0x28] sm:$0xf] %vm762_vm2, %v1181_v49  ;;  %v1182_v53 = vpack.c.bf16 %v693_v50, %v693_v50 }
 0x1db   : > { %771 = vst.msk [vmem:[%s1466_s28 + $0x20] sm:$0xf] %vm762_vm2, %v1179_v51  ;;  %v1180_v54 = vpack.c.bf16 %v691_v52, %v691_v52  ;;  %v1268_v55 = vpop.f32.mrb[8].mxu1 }
 0x1dc   : > { %774 = vst.msk [vmem:[%s1466_s28 + $0x2c] sm:$0xf] %vm762_vm2, %v1182_v53  ;;  %v676_v56 = vadd.f32 %v1268_v55, %v1457_v2  ;;  %v667_v57 = vpop.f32.mrb[9].mxu1 }
 0x1dd   : > { %772 = vst.msk [vmem:[%s1466_s28 + $0x24] sm:$0xf] %vm762_vm2, %v1180_v54  ;;  %v668_v58 = vadd.f32 %v1457_v2, %v667_v57  ;;  %v1269_v59 = vpop.f32.mrb[10].mxu1 }
 0x1de   : > { %v696_v60 = vmax.f32 %v676_v56, 0.0  ;;  %v679_v61 = vadd.f32 %v1269_v59, %v1457_v2  ;;  %v670_v62 = vpop.f32.mrb[11].mxu1 }
 0x1df   : > { %v694_v63 = vmax.f32 %v668_v58, 0.0  ;;  %v671_v0 = vadd.f32 %v1457_v2, %v670_v62 }
 0x1e0   : > { %v1185_v1 = vpack.c.bf16 %v696_v60, %v696_v60  ;;  %v697_v10 = vmax.f32 %v679_v61, 0.0 }
 0x1e1   : > { %v1183_v11 = vpack.c.bf16 %v694_v63, %v694_v63  ;;  %v695_v13 = vmax.f32 %v671_v0, 0.0 }
 0x1e2   : > { %777 = vst.msk [vmem:[%s1466_s28 + $0x38] sm:$0xf] %vm762_vm2, %v1185_v1  ;;  %v1186_v3 = vpack.c.bf16 %v697_v10, %v697_v10 }
 0x1e3   : > { %775 = vst.msk [vmem:[%s1466_s28 + $0x30] sm:$0xf] %vm762_vm2, %v1183_v11  ;;  %v1184_v4 = vpack.c.bf16 %v695_v13, %v695_v13  ;;  %v1276_v5 = vpop.f32.mrb[12].mxu1 }
 0x1e4   : > { %778 = vst.msk [vmem:[%s1466_s28 + $0x3c] sm:$0xf] %vm762_vm2, %v1186_v3  ;;  %v845_v2 = vadd.f32 %v1276_v5, %v1508_v14  ;;  %v836_v6 = vpop.f32.mrb[13].mxu1 }
 0x1e5   : > { %776 = vst.msk [vmem:[%s1466_s28 + $0x34] sm:$0xf] %vm762_vm2, %v1184_v4  ;;  %v837_v12 = vadd.f32 %v1508_v14, %v836_v6  ;;  %v1277_v15 = vpop.f32.mrb[14].mxu1 }
 0x1e6   : > { %v901_v7 = vmax.f32 %v845_v2, 0.0  ;;  %v848_v16 = vadd.f32 %v1277_v15, %v1508_v14  ;;  %v839_v8 = vpop.f32.mrb[15].mxu1 }
 0x1e7   : > { %v899_v9 = vmax.f32 %v837_v12, 0.0  ;;  %v840_v17 = vadd.f32 %v1508_v14, %v839_v8 }
 0x1e8   : > { %v1189_v18 = vpack.c.bf16 %v901_v7, %v901_v7  ;;  %v902_v19 = vmax.f32 %v848_v16, 0.0 }
 0x1e9   : > { %v1187_v20 = vpack.c.bf16 %v899_v9, %v899_v9  ;;  %v900_v21 = vmax.f32 %v840_v17, 0.0 }
 0x1ea   : > { %981 = vst.msk [vmem:[%s1525_s12 + $0x8] sm:$0xf] %vm762_vm2, %v1189_v18  ;;  %v1190_v22 = vpack.c.bf16 %v902_v19, %v902_v19 }
 0x1eb   : > { %979 = vst.msk [vmem:[%s1525_s12] sm:$0xf] %vm762_vm2, %v1187_v20  ;;  %v1188_v23 = vpack.c.bf16 %v900_v21, %v900_v21  ;;  %v1280_v24 = vpop.f32.mrb[16].mxu1 }
 0x1ec   : > { %982 = vst.msk [vmem:[%s1525_s12 + $0xc] sm:$0xf] %vm762_vm2, %v1190_v22  ;;  %v861_v25 = vadd.f32 %v1280_v24, %v1508_v14  ;;  %v852_v26 = vpop.f32.mrb[17].mxu1 }
 0x1ed   : > { %980 = vst.msk [vmem:[%s1525_s12 + $0x4] sm:$0xf] %vm762_vm2, %v1188_v23  ;;  %v853_v27 = vadd.f32 %v1508_v14, %v852_v26  ;;  %v1281_v28 = vpop.f32.mrb[18].mxu1 }
 0x1ee   : > { %v905_v29 = vmax.f32 %v861_v25, 0.0  ;;  %v864_v30 = vadd.f32 %v1281_v28, %v1508_v14  ;;  %v855_v31 = vpop.f32.mrb[19].mxu1 }
 0x1ef   : > { %v903_v32 = vmax.f32 %v853_v27, 0.0  ;;  %v856_v33 = vadd.f32 %v1508_v14, %v855_v31 }
 0x1f0   : > { %v1193_v34 = vpack.c.bf16 %v905_v29, %v905_v29  ;;  %v906_v35 = vmax.f32 %v864_v30, 0.0 }
 0x1f1   : > { %v1191_v36 = vpack.c.bf16 %v903_v32, %v903_v32  ;;  %v904_v37 = vmax.f32 %v856_v33, 0.0 }
 0x1f2   : > { %985 = vst.msk [vmem:[%s1525_s12 + $0x18] sm:$0xf] %vm762_vm2, %v1193_v34  ;;  %v1194_v38 = vpack.c.bf16 %v906_v35, %v906_v35 }
 0x1f3   : > { %983 = vst.msk [vmem:[%s1525_s12 + $0x10] sm:$0xf] %vm762_vm2, %v1191_v36  ;;  %v1192_v39 = vpack.c.bf16 %v904_v37, %v904_v37  ;;  %v1284_v40 = vpop.f32.mrb[20].mxu1 }
 0x1f4   : > { %986 = vst.msk [vmem:[%s1525_s12 + $0x1c] sm:$0xf] %vm762_vm2, %v1194_v38  ;;  %v877_v41 = vadd.f32 %v1284_v40, %v1508_v14  ;;  %v868_v42 = vpop.f32.mrb[21].mxu1 }
 0x1f5   : > { %984 = vst.msk [vmem:[%s1525_s12 + $0x14] sm:$0xf] %vm762_vm2, %v1192_v39  ;;  %v869_v43 = vadd.f32 %v1508_v14, %v868_v42  ;;  %v1285_v44 = vpop.f32.mrb[22].mxu1 }
 0x1f6   : > { %v909_v45 = vmax.f32 %v877_v41, 0.0  ;;  %v880_v46 = vadd.f32 %v1285_v44, %v1508_v14  ;;  %v871_v47 = vpop.f32.mrb[23].mxu1 }
 0x1f7   : > { %v907_v48 = vmax.f32 %v869_v43, 0.0  ;;  %v872_v49 = vadd.f32 %v1508_v14, %v871_v47 }
 0x1f8   : > { %v1197_v50 = vpack.c.bf16 %v909_v45, %v909_v45  ;;  %v910_v51 = vmax.f32 %v880_v46, 0.0 }
 0x1f9   : > { %v1195_v52 = vpack.c.bf16 %v907_v48, %v907_v48  ;;  %v908_v53 = vmax.f32 %v872_v49, 0.0 }
 0x1fa   : > { %989 = vst.msk [vmem:[%s1525_s12 + $0x28] sm:$0xf] %vm762_vm2, %v1197_v50  ;;  %v1198_v54 = vpack.c.bf16 %v910_v51, %v910_v51 }
 0x1fb   : > { %987 = vst.msk [vmem:[%s1525_s12 + $0x20] sm:$0xf] %vm762_vm2, %v1195_v52  ;;  %v1196_v55 = vpack.c.bf16 %v908_v53, %v908_v53  ;;  %v1288_v56 = vpop.f32.mrb[24].mxu1 }
 0x1fc   : > { %990 = vst.msk [vmem:[%s1525_s12 + $0x2c] sm:$0xf] %vm762_vm2, %v1198_v54  ;;  %v893_v57 = vadd.f32 %v1288_v56, %v1508_v14  ;;  %v884_v58 = vpop.f32.mrb[25].mxu1 }
 0x1fd   : > { %988 = vst.msk [vmem:[%s1525_s12 + $0x24] sm:$0xf] %vm762_vm2, %v1196_v55  ;;  %v885_v59 = vadd.f32 %v1508_v14, %v884_v58  ;;  %v1289_v60 = vpop.f32.mrb[26].mxu1 }
 0x1fe   : > { %v913_v61 = vmax.f32 %v893_v57, 0.0  ;;  %v896_v62 = vadd.f32 %v1289_v60, %v1508_v14  ;;  %v887_v63 = vpop.f32.mrb[27].mxu1 }
 0x1ff   : > { %v911_v0 = vmax.f32 %v885_v59, 0.0  ;;  %v888_v1 = vadd.f32 %v1508_v14, %v887_v63 }
 0x200   : > { %v1201_v10 = vpack.c.bf16 %v913_v61, %v913_v61  ;;  %v914_v11 = vmax.f32 %v896_v62, 0.0 }
 0x201   : > { %v1199_v13 = vpack.c.bf16 %v911_v0, %v911_v0  ;;  %v912_v3 = vmax.f32 %v888_v1, 0.0 }
 0x202   : > { %993 = vst.msk [vmem:[%s1525_s12 + $0x38] sm:$0xf] %vm762_vm2, %v1201_v10  ;;  %v1202_v4 = vpack.c.bf16 %v914_v11, %v914_v11 }
 0x203   : > { %991 = vst.msk [vmem:[%s1525_s12 + $0x30] sm:$0xf] %vm762_vm2, %v1199_v13  ;;  %v1200_v5 = vpack.c.bf16 %v912_v3, %v912_v3 }
 0x204   : > { %994 = vst.msk [vmem:[%s1525_s12 + $0x3c] sm:$0xf] %vm762_vm2, %v1202_v4 }
 0x205   : > { %992 = vst.msk [vmem:[%s1525_s12 + $0x34] sm:$0xf] %vm762_vm2, %v1200_v5 }
 0x206 PF: > { %s19_s27 = sadd.s32 1, %s1319_s27  }
 0x207   : > { %p16_p4 = scmp.ge.s32.totalorder %s19_s27, 4  }
 0x209   :  { %18 = sbr.rel (!%p16_p4) target bundleno = 1 (0x1), region = 90 }

</bundles_post_ra>
